<compile_context>
chip_gen: v7x
topology: tpu7x:2x2x1
jax: 0.10.0
libtpu: 0.0.40
codegen_flags: <defaults>
</compile_context>

<pallas_src>
import jax
import jax.numpy as jnp
from jax.experimental import pallas as pl
from jax.experimental.pallas import tpu as pltpu


_TILE_BUDGET_BYTES = 40 * 1024 * 1024   # double-buffered working set target (v7x-safe)
_VMEM_LIMIT_BYTES = 56 * 1024 * 1024    # raised scoped VMEM limit (< 64 MiB v7x physical/TC)


def _round_up(n, m):
    return ((n + m - 1) // m) * m


def _choose_tm(rows, hp, itemsize):
    """Rows per block. Budget accounts for double-buffered x plus the lane-padded
    mask/out buffers (each (TM, k) block occupies TM*128*4 bytes in VMEM regardless of k)."""
    lane_hp = _round_up(hp, 128)
    per_row = 2 * lane_hp * itemsize + 4 * 128 * 4
    tm = _TILE_BUDGET_BYTES // per_row
    tm = max(128, (tm // 128) * 128)            # multiple of 128 (covers bf16 16-row packing)
    if tm >= rows:
        if rows >= 256:
            # Split into >= 2 blocks so the v7x megacore "parallel" axis has work for both TCs.
            tm = _round_up((rows + 1) // 2, 128)
        else:
            tm = rows                           # single block == full dim: always layout-legal
    return tm


def _classifier_kernel(x_ref, w_ref, b_ref, mask_ref, o_ref):
    # General path (H >= 128 or packing not applicable).
    # x_ref: (TM, H) native dtype | w_ref: (1, H) f32 | b_ref: (1,) f32 SMEM
    # mask_ref/o_ref: (TM, 1) f32
    # f32 upcast kept for v5e (no bf16 VPU); the reduction is VPU mul + XLU lane-sum.
    x = x_ref[...].astype(jnp.float32)
    w = w_ref[...]
    h = jnp.sum(x * w, axis=-1, keepdims=True) + b_ref[0]
    o_ref[...] = jax.nn.sigmoid(h) * mask_ref[...]


def _classifier_kernel_packed(x_ref, wbd_ref, b_ref, mask_ref, o_ref):
    # Lane-packed small-H path: x rows hold k original rows side by side (k*H lanes).
    # The segmented reduction is a single MXU matmul against a block-diagonal weight (k*H, k);
    # x stays in its native dtype (bf16 goes straight to the MXU), accumulate in f32.
    s = jnp.dot(x_ref[...], wbd_ref[...], preferred_element_type=jnp.float32) + b_ref[0]
    o_ref[...] = jax.nn.sigmoid(s) * mask_ref[...]


def simple_classifier(x, mask_cls, weight, bias):
    """Pallas equivalent of SimpleClassifier.forward.

    x:        (B, S, H) float32 or bfloat16
    mask_cls: (B, S)    any dtype (treated as mask_cls.float())
    weight:   (1, H)    nn.Linear(H, 1) weight
    bias:     (1,)      nn.Linear bias
    returns:  (B, S)    float32 sentence scores
    """
    B, S, H = x.shape
    M = B * S
    x_dtype = x.dtype
    itemsize = jnp.dtype(x_dtype).itemsize

    # Small-H packing factor.
    k = 128 // H if H < 128 else 1
    k = max(1, k)
    if k > 1 and M % k != 0:
        k = 1  # TODO(synk): could pad <=k-1 rows instead; fallback keeps wrapper copy-free.

    rows = M // k
    hp = k * H

    x2 = x.reshape(rows, hp)                                   # free contiguous reshape
    mask2 = mask_cls.astype(jnp.float32).reshape(rows, k)
    b = bias.reshape(1).astype(jnp.float32)

    TM = _choose_tm(rows, hp, itemsize)
    grid_m = pl.cdiv(rows, TM)

    if k == 1:
        kernel = _classifier_kernel
        w_arg = weight.reshape(1, H).astype(jnp.float32)       # lane-dense, VMEM-resident
        w_spec = pl.BlockSpec((1, H), lambda i: (0, 0))
    else:
        kernel = _classifier_kernel_packed
        w_dtype = x_dtype if jnp.issubdtype(x_dtype, jnp.floating) else jnp.float32
        w_row = weight.reshape(H).astype(w_dtype)
        eye = jnp.eye(k, dtype=w_dtype)
        # wbd[j*H + h, j] = w[h]  (block-diagonal), matching x2[r, j*H + h] = x_flat[r*k + j, h].
        w_arg = (eye[:, None, :] * w_row[None, :, None]).reshape(hp, k)
        w_spec = pl.BlockSpec((hp, k), lambda i: (0, 0))

    cost = pl.CostEstimate(
        flops=2 * M * H + 4 * M,
        transcendentals=M,
        bytes_accessed=M * H * itemsize + 2 * M * 4 + hp * k * 4 + 4,
    )

    out = pl.pallas_call(
        kernel,
        out_shape=jax.ShapeDtypeStruct((rows, k), jnp.float32),
        grid=(grid_m,),
        in_specs=[
            pl.BlockSpec((TM, hp), lambda i: (i, 0)),                 # x tile (double-buffered)
            w_spec,                                                   # weight (resident)
            pl.BlockSpec(memory_space=pltpu.MemorySpace.SMEM),        # bias scalar
            pl.BlockSpec((TM, k), lambda i: (i, 0)),                  # mask tile
        ],
        out_specs=pl.BlockSpec((TM, k), lambda i: (i, 0)),
        compiler_params=pltpu.CompilerParams(
            dimension_semantics=("parallel",),
            vmem_limit_bytes=_VMEM_LIMIT_BYTES,
        ),
        cost_estimate=cost,
    )(x2, w_arg, b, mask2)

    # rows * k == M exactly -> no slicing, just reshape back.
    return out.reshape(B, S)


if __name__ == "__main__":
    key = jax.random.PRNGKey(0)
    kx, km, kw, kb, kx2, km2, kw2, kb2 = jax.random.split(key, 8)

    # Case 1: shapes implied by the module with a small hidden size (H=32) -> packed path (k=4).
    B, S, H = 2, 8, 32
    x = jax.random.normal(kx, (B, S, H), dtype=jnp.float32)
    mask_cls = (jax.random.uniform(km, (B, S)) > 0.3).astype(jnp.int32)
    weight = jax.random.normal(kw, (1, H), dtype=jnp.float32) * 0.1
    bias = jax.random.normal(kb, (1,), dtype=jnp.float32) * 0.1

    scores = simple_classifier(x, mask_cls, weight, bias)
    jax.block_until_ready(scores)

    ref = jax.nn.sigmoid(
        jnp.einsum("bsh,h->bs", x, weight[0], precision=jax.lax.Precision.HIGHEST) + bias[0]
    ) * mask_cls.astype(jnp.float32)
    assert scores.shape == (B, S)
    # Loose tolerance: the in-kernel MXU f32 matmul may run with bf16 passes at default precision.
    assert jnp.allclose(scores, ref, atol=5e-3, rtol=0.0), "packed-path mismatch vs reference"

    # Case 2: H >= 128 -> exercises the general (VPU lane-reduce, exact f32) path.
    B2, S2, H2 = 2, 8, 256
    xg = jax.random.normal(kx2, (B2, S2, H2), dtype=jnp.float32)
    mg = (jax.random.uniform(km2, (B2, S2)) > 0.3).astype(jnp.int32)
    wg = jax.random.normal(kw2, (1, H2), dtype=jnp.float32) * 0.05
    bg = jax.random.normal(kb2, (1,), dtype=jnp.float32) * 0.05

    scores2 = simple_classifier(xg, mg, wg, bg)
    jax.block_until_ready(scores2)

    ref2 = jax.nn.sigmoid(
        jnp.einsum("bsh,h->bs", xg, wg[0], precision=jax.lax.Precision.HIGHEST) + bg[0]
    ) * mg.astype(jnp.float32)
    assert jnp.allclose(scores2, ref2, atol=1e-5, rtol=1e-5), "general-path mismatch vs reference"

    print("KERNEL_OK")
</pallas_src>

<mosaic_0001>
module attributes {stable_mosaic.version = 11 : i64} {
  func.func @_classifier_kernel_packed(%arg0: i32, %arg1: memref<4x128xf32, #tpu.memory_space<vmem>>, %arg2: memref<128x4xf32, #tpu.memory_space<vmem>>, %arg3: memref<1xf32, #tpu.memory_space<smem>>, %arg4: memref<4x4xf32, #tpu.memory_space<vmem>>, %arg5: memref<4x4xf32, #tpu.memory_space<vmem>>) attributes {dimension_semantics = [#tpu.dimension_semantics<parallel>], iteration_bounds = array<i64: 1>, scalar_prefetch = 0 : i64, scratch_operands = 0 : i64, tpu.core_type = #tpu.core_type<tc>, window_params = [{transform_indices = @transform_0, window_bounds = array<i64: 4, 128>}, {pipeline_mode = #tpu.pipeline_mode<synchronous>, transform_indices = @transform_1, window_bounds = array<i64: 128, 4>}, {transform_indices = @transform_2, window_bounds = array<i64: 1>}, {transform_indices = @transform_3, window_bounds = array<i64: 4, 4>}, {transform_indices = @transform_4, window_bounds = array<i64: 4, 4>}]} {
    %c0 = arith.constant 0 : index
    %c0_0 = arith.constant 0 : index
    %0 = vector.load %arg1[%c0, %c0_0] : memref<4x128xf32, #tpu.memory_space<vmem>>, vector<4x128xf32>
    %c0_1 = arith.constant 0 : index
    %c0_2 = arith.constant 0 : index
    %1 = vector.load %arg2[%c0_1, %c0_2] : memref<128x4xf32, #tpu.memory_space<vmem>>, vector<128x4xf32>
    %cst = arith.constant dense<0.000000e+00> : vector<4x4xf32>
    %2 = tpu.matmul %0, %1, %cst {dimension_numbers = #tpu.dot_dimension_numbers<[1], [0], [0], [1], [0, 0, 1, 1], [], []>} : vector<4x128xf32>, vector<128x4xf32>, vector<4x4xf32> -> vector<4x4xf32>
    %c0_3 = arith.constant 0 : index
    %3 = memref.load %arg3[%c0_3] : memref<1xf32, #tpu.memory_space<smem>>
    %4 = vector.broadcast %3 : f32 to vector<4x4xf32>
    %5 = arith.addf %2, %4 : vector<4x4xf32>
    %6 = arith.negf %5 : vector<4x4xf32>
    %7 = math.exp %6 : vector<4x4xf32>
    %cst_4 = arith.constant 1.000000e+00 : f32
    %8 = vector.broadcast %cst_4 : f32 to vector<4x4xf32>
    %9 = arith.addf %8, %7 : vector<4x4xf32>
    %10 = arith.divf %8, %9 : vector<4x4xf32>
    %c0_5 = arith.constant 0 : index
    %c0_6 = arith.constant 0 : index
    %11 = vector.load %arg4[%c0_5, %c0_6] : memref<4x4xf32, #tpu.memory_space<vmem>>, vector<4x4xf32>
    %12 = arith.mulf %10, %11 : vector<4x4xf32>
    %c0_7 = arith.constant 0 : index
    %c0_8 = arith.constant 0 : index
    %13 = vector.load %arg5[%c0_7, %c0_8] : memref<4x4xf32, #tpu.memory_space<vmem>>, vector<4x4xf32>
    tpu.vector_store %arg5[%c0_7, %c0_8], %12 {strides = array<i32>} : memref<4x4xf32, #tpu.memory_space<vmem>>, vector<4x4xf32>,
    return
  }
  func.func @transform_0(%arg0: i32) -> (i32, i32) {
    %c0_i32 = arith.constant 0 : i32
    %c0_i32_0 = arith.constant 0 : i32
    return %arg0, %c0_i32 : i32, i32
  }
  func.func @transform_1(%arg0: i32) -> (i32, i32) {
    %c0_i32 = arith.constant 0 : i32
    %c0_i32_0 = arith.constant 0 : i32
    %c0_i32_1 = arith.constant 0 : i32
    return %c0_i32, %c0_i32_0 : i32, i32
  }
  func.func @transform_2(%arg0: i32) -> i32 {
    %c0_i32 = arith.constant 0 : i32
    %c0_i32_0 = arith.constant 0 : i32
    return %c0_i32 : i32
  }
  func.func @transform_3(%arg0: i32) -> (i32, i32) {
    %c0_i32 = arith.constant 0 : i32
    %c0_i32_0 = arith.constant 0 : i32
    return %arg0, %c0_i32 : i32, i32
  }
  func.func @transform_4(%arg0: i32) -> (i32, i32) {
    %c0_i32 = arith.constant 0 : i32
    %c0_i32_0 = arith.constant 0 : i32
    return %arg0, %c0_i32 : i32, i32
  }
}

</mosaic_0001>

<bundles_post_ra>
// kernel: tpu_custom_call.1
= control target key start
LH: loop header
LB: loop body
LE: loop exit
PB: predicated region body
PF: predicated region fallthrough
CT: control target
= control target key end

     0   :  { %v241_v3 = vmov 0.0|0.0   ;;  %vm242_vm0 = vmmov 0   ;;  %v243_v6 = vmov 0.0   ;;  %s339_s0 = inlined_call_operand.vmem [shape: f32[4,128], index: 0, kind: input, shape index: {}]   ;;  %s340_s1 = inlined_call_operand.vmem [shape: f32[128,4], index: 1, kind: input, shape index: {}]   ;;  %s341_s2 = inlined_call_operand.<no memory space> [shape: f32[1], index: 2, kind: input, shape index: {}]   ;;  %s342_s3 = inlined_call_operand.vmem [shape: f32[4,4], index: 3, kind: input, shape index: {}]   ;;  %s343_s4 = inlined_call_operand.hbm [shape: f32[4,4], index: 4, kind: output, shape index: {}]  }
   0x1   :  { %v20_v0 = vld [vmem:[%s340_s1] sm:$0xff]  ;;  %v21_v1 = vld [vmem:[%s340_s1 + $0x8] sm:$0xff]  ;;  %v22_v2 = vld [vmem:[%s340_s1 + $0x10] sm:$0xff]  ;;  %185 = vmatprep.subr.bf16.mxu0 %v241_v3  ;;  %182 = vmatprep.mubr.msk.f32.mxu0 %vm242_vm0, %v243_v6 }
   0x2   :  { %v186_v4 = vpack.c.bf16 %v21_v1, %v20_v0  ;;  %v23_v5 = vld [vmem:[%s340_s1 + $0x18] sm:$0xff]  ;;  %v24_v8 = vld [vmem:[%s340_s1 + $0x20] sm:$0xff]  ;;  %v25_v9 = vld [vmem:[%s340_s1 + $0x28] sm:$0xff] }
   0x3   :  { %v189_v7 = vpack.c.bf16 %v23_v5, %v22_v2 }
   0x4   :  { %187 = vmatpush3.bf16.msra.mxu0 %v186_v4 }
   0x5   :  { %188 = vmatprep.subr.bf16.mxu0 %v241_v3 }
   0x6   :  { %10 = vsyncpa [#allocation4], 0  ;;  %v192_v10 = vpack.c.bf16 %v25_v9, %v24_v8  ;;  %v26_v11 = vld [vmem:[%s340_s1 + $0x30] sm:$0xff]  ;;  %v27_v12 = vld [vmem:[%s340_s1 + $0x38] sm:$0xff]  ;;  %v37_v27 = vstv %s341_s2  ;;  %s244_s26 = smov [#allocation3]   ;;  %vm116_vm1 = vcmask 27648  }
   0x7   :  { %v195_v13 = vpack.c.bf16 %v27_v12, %v26_v11  ;;  %v28_v14 = vld [vmem:[%s340_s1 + $0x40] sm:$0xff]  ;;  %v29_v15 = vld [vmem:[%s340_s1 + $0x48] sm:$0xff]  ;;  %v30_v17 = vld [vmem:[%s340_s1 + $0x50] sm:$0xff]  ;;  %s124_s27 = sshll.u32 %s244_s26, 4  ;;  %s125_s27 = int_to_ptr.vmem [resolvable:$true] %s124_s27 }
   0x8   :  { %190 = vmatpush3.bf16.msra.mxu0 %v189_v7  ;;  %v198_v16 = vpack.c.bf16 %v29_v15, %v28_v14  ;;  %v31_v18 = vld [vmem:[%s340_s1 + $0x58] sm:$0xff]  ;;  %v32_v20 = vld [vmem:[%s340_s1 + $0x60] sm:$0xff]  ;;  %v33_v21 = vld [vmem:[%s340_s1 + $0x68] sm:$0xff]  ;;  %p222_p1 = scmp.lt.s32.totalorder %s125_s27, %s125_s27 }
   0x9   :  { %191 = vmatprep.subr.bf16.mxu0 %v241_v3  ;;  %v201_v19 = vpack.c.bf16 %v31_v18, %v30_v17  ;;  %v204_v22 = vpack.c.bf16 %v33_v21, %v32_v20  ;;  %v34_v23 = vld [vmem:[%s340_s1 + $0x70] sm:$0xff]  ;;  %v35_v24 = vld [vmem:[%s340_s1 + $0x78] sm:$0xff]  ;;  %v19_v26 = vld [vmem:[%s339_s0] sm:$0xf]  ;;  %s217_s0 = scalar_lea.vmem %s125_s27, 64 }
   0xa   :  { %v207_v25 = vpack.c.bf16 %v35_v24, %v34_v23  ;;  %v114_v34 = vld [vmem:[%s342_s3] sm:$0xf]  ;;  %p218_p0 = scmp.ne.s32.totalorder %s125_s27, %s217_s0  ;;  %p223_p2 = scmp.lt.s32.totalorder %s217_s0, %s217_s0 }
   0xc   :  { %193 = vmatpush3.bf16.msra.mxu0 %v192_v10  ;;  %p224_p3 = por %p223_p2, %p222_p1 }
   0xd   :  { %194 = vmatprep.subr.bf16.mxu0 %v241_v3 }
   0xe   :  { %p225_p4 = pnand %p224_p3, %p218_p0 }
  0x10   :  { %196 = vmatpush3.bf16.msra.mxu0 %v195_v13 }
  0x11   :  { %197 = vmatprep.subr.bf16.mxu0 %v241_v3 }
  0x14   :  { %199 = vmatpush3.bf16.msra.mxu0 %v198_v16 }
  0x15   :  { %200 = vmatprep.subr.bf16.mxu0 %v241_v3 }
  0x18   :  { %202 = vmatpush3.bf16.msra.mxu0 %v201_v19 }
  0x19   :  { %203 = vmatprep.subr.bf16.mxu0 %v241_v3 }
  0x1c   :  { %205 = vmatpush3.bf16.msra.mxu0 %v204_v22 }
  0x1d   :  { %206 = vmatprep.subr.bf16.mxu0 %v241_v3 }
  0x20   :  { %208 = vmatpush3.bf16.msra.mxu0 %v207_v25 }
  0x23   :  { %183 = vmatmul.mubr.f32.vlgmr.msra.gmra.mrb[0].mxu0 %v19_v26 }
  0xf6   :  { %v104_v28 = vpop.f32.mrb[0].mxu0 }
  0xf7   :  { %v105_v29 = vadd.f32 %v104_v28, %v37_v27  ;;  %v184_v30 = vpop.f32.mrb[1].mxu0 }
  0xf9   :  { %v132_v31 = vmul.f32 -1.442695, %v105_v29 }
  0xfb   :  { %213 = vpow2.f32 %v132_v31 }
 0x105   :  { %v214_v32 = vpop.eup %213 }
 0x106   :  { %v111_v33 = vadd.f32 1.0, %v214_v32 }
 0x108   :  { %215 = vrcp.f32 %v111_v33 }
 0x112   :  { %v216_v35 = vpop.eup %215 }
 0x113   :  { %v115_v36 = vmul.f32 %v216_v35, %v114_v34 }
 0x115   :  { %117 = vst.msk [vmem:[#allocation3] sm:$0xf] %vm116_vm1, %v115_v36 }
 0x116   :  { %228 = shalt.err (!%p225_p4)
}
 0x117   :  { %s229_s29 = scalar_lea.hbm %s343_s4, 64 }
 0x118   :  { %p230_p5 = scmp.ne.s32.totalorder %s343_s4, %s229_s29  ;;  %p233_p6 = scmp.lt.u32.totalorder %s229_s29, %s343_s4 }
 0x11a   :  { %p235_p7 = pnand %p233_p6, %p230_p5 }
 0x11c   :  { %238 = shalt.err (!%p235_p7)
}
 0x11d   :  { %127 = dma.vmem_to_hbm [thread:$0]  %s125_s27, 64, %s343_s4, [#allocation4]  }
 0x11e   :  { %239 = dma.done.wait [#allocation4], 64  }
 0x11f   :  { %240 = vsyncadd [#allocation4], 4294967232 }
 0x120   :  { %131 = vsyncpa [#allocation4], 1 }

</bundles_post_ra>
